<compile_context>
chip_gen: v7x
topology: tpu7x:2x2x1
jax: 0.10.0
libtpu: 0.0.40
codegen_flags: <defaults>
</compile_context>

<pallas_src>
import math

import jax
import jax.numpy as jnp
from jax.experimental import pallas as pl
from jax.experimental.pallas import tpu as pltpu


def _bias_kernel(x_ref, b_ref, o_ref):
    # x_ref: (TR, L) VMEM tile; b_ref: (1, L).  VPU broadcast-add across sublanes.
    o_ref[...] = (x_ref[...] + b_ref[...]).astype(o_ref.dtype)


def bias_forward(x: jax.Array, bias: jax.Array, *, donate: bool = False) -> jax.Array:
    """x + bias, bias broadcast along the last axis of x (PyTorch semantics)."""
    size = bias.shape[0]
    assert x.shape[-1] == size, "last dim of x must match bias size"

    orig_shape = x.shape
    b_vec = bias.astype(x.dtype)          # compute & store entirely in x.dtype
    x2d = x.reshape(-1, size)             # (rows, size)
    rows = x2d.shape[0]

    dtype_bytes = jnp.dtype(x.dtype).itemsize

    # --- Lane packing: make the lane extent a multiple of 128 whenever cheap.
    # Fold g = L/size rows into the lane axis with L = lcm(size, 128) so stores
    # are lane-dense (unmasked vst) instead of masked partial stores.
    lane = size
    lcm_lane = math.lcm(size, 128)
    g = lcm_lane // size
    if (g > 1 and rows >= g and rows % g == 0
            and lcm_lane * dtype_bytes <= 256 * 1024):   # keep a single row tiny
        rows = rows // g
        lane = lcm_lane
        x2d = x2d.reshape(rows, lane)
        b_vec = jnp.tile(b_vec, g)         # tiny (g*size,) bias, built once
    b2d = b_vec.reshape(1, lane)

    # --- Row-tile selection: largest sublane-multiple with ~8 MiB per tile.
    sublane = max(8, 32 // max(dtype_bytes, 1))          # 8 f32, 16 bf16, 32 int8
    row_bytes = max(lane * dtype_bytes, 1)
    target_tile_bytes = 8 * 1024 * 1024
    tr = max(sublane, (target_tile_bytes // row_bytes) // sublane * sublane)
    if tr >= rows:
        tr = rows                          # full-extent block is always legal
        slab_bytes = rows * row_bytes
        # Force >=2 grid steps for mid-size slabs so both v7x TensorCores get
        # work (no effect on v5e/v6e beyond a trivially small extra step).
        if slab_bytes > 2 * 1024 * 1024 and rows >= 2 * sublane:
            half = pl.cdiv(rows, 2)
            tr = max(sublane, pl.cdiv(half, sublane) * sublane)
    grid = (pl.cdiv(rows, tr),)            # ragged last tile handled by Pallas

    # --- Explicit VMEM budget: 2 in-bufs + 2 out-bufs per tile + bias + slack.
    tile_bytes = tr * lane * dtype_bytes
    vmem_limit = int(4 * tile_bytes * 1.2) + 2 * lane * dtype_bytes + (1 << 20)
    vmem_limit = max(2 * 1024 * 1024, min(vmem_limit, 48 * 1024 * 1024))

    out = pl.pallas_call(
        _bias_kernel,
        out_shape=jax.ShapeDtypeStruct((rows, lane), x.dtype),
        grid_spec=pltpu.PrefetchScalarGridSpec(
            num_scalar_prefetch=0,
            grid=grid,
            in_specs=[
                pl.BlockSpec((tr, lane), lambda i: (i, 0)),   # x row-tile
                pl.BlockSpec((1, lane), lambda i: (0, 0)),    # bias, resident
            ],
            out_specs=pl.BlockSpec((tr, lane), lambda i: (i, 0)),
        ),
        compiler_params=pltpu.CompilerParams(
            dimension_semantics=("parallel",),
            vmem_limit_bytes=vmem_limit,
        ),
        input_output_aliases=({0: 0} if donate else {}),
    )(x2d, b2d)

    return out.reshape(orig_shape)


if __name__ == "__main__":
    # Module parameter: bias of shape (size,), zero-initialized (reset_parameters).
    size = 32
    bias = jnp.zeros((size,), dtype=jnp.float32)

    # Deterministic small input: (batch=2, seq=8, hidden=32); bias broadcasts on last dim.
    key = jax.random.PRNGKey(0)
    kx, kb = jax.random.split(key)
    x = jax.random.normal(kx, (2, 8, size), dtype=jnp.float32)

    # Forward with the module's (zero) bias.
    y = bias_forward(x, bias)
    jax.block_until_ready(y)
    ref = x + bias
    assert y.shape == x.shape and y.dtype == x.dtype
    assert jnp.allclose(y, ref, atol=0.0, rtol=0.0), "mismatch vs reference (zero bias)"

    # Non-zero bias to exercise the broadcast / lane-packing path.
    bias_nz = jax.random.normal(kb, (size,), dtype=jnp.float32)
    y_nz = bias_forward(x, bias_nz)
    jax.block_until_ready(y_nz)
    ref_nz = x + bias_nz
    assert jnp.allclose(y_nz, ref_nz, atol=0.0, rtol=0.0), "mismatch vs reference (nonzero bias)"

    # Mixed dtype: bf16 input with f32 parameter -> kernel computes/stores in bf16.
    x_bf16 = x.astype(jnp.bfloat16)
    y_bf16 = bias_forward(x_bf16, bias_nz)
    jax.block_until_ready(y_bf16)
    ref_bf16 = x_bf16 + bias_nz.astype(jnp.bfloat16)
    assert y_bf16.dtype == jnp.bfloat16
    assert jnp.allclose(y_bf16, ref_bf16, atol=0.0, rtol=0.0), "mismatch vs reference (bf16)"

    print("KERNEL_OK")
</pallas_src>

<mosaic_0001>
module attributes {stable_mosaic.version = 11 : i64} {
  func.func @_bias_kernel(%arg0: i32, %arg1: memref<4x128xf32, #tpu.memory_space<vmem>>, %arg2: memref<1x128xf32, #tpu.memory_space<vmem>>, %arg3: memref<4x128xf32, #tpu.memory_space<vmem>>) attributes {dimension_semantics = [#tpu.dimension_semantics<parallel>], iteration_bounds = array<i64: 1>, scalar_prefetch = 0 : i64, scratch_operands = 0 : i64, tpu.core_type = #tpu.core_type<tc>, window_params = [{transform_indices = @transform_0, window_bounds = array<i64: 4, 128>}, {pipeline_mode = #tpu.pipeline_mode<synchronous>, transform_indices = @transform_1, window_bounds = array<i64: 1, 128>}, {transform_indices = @transform_2, window_bounds = array<i64: 4, 128>}]} {
    %c0 = arith.constant 0 : index
    %c0_0 = arith.constant 0 : index
    %0 = vector.load %arg1[%c0, %c0_0] : memref<4x128xf32, #tpu.memory_space<vmem>>, vector<4x128xf32>
    %c0_1 = arith.constant 0 : index
    %c0_2 = arith.constant 0 : index
    %1 = vector.load %arg2[%c0_1, %c0_2] : memref<1x128xf32, #tpu.memory_space<vmem>>, vector<1x128xf32>
    %2 = vector.broadcast %1 : vector<1x128xf32> to vector<4x128xf32>
    %3 = arith.addf %0, %2 : vector<4x128xf32>
    %c0_3 = arith.constant 0 : index
    %c0_4 = arith.constant 0 : index
    %4 = vector.load %arg3[%c0_3, %c0_4] : memref<4x128xf32, #tpu.memory_space<vmem>>, vector<4x128xf32>
    tpu.vector_store %arg3[%c0_3, %c0_4], %3 {strides = array<i32>} : memref<4x128xf32, #tpu.memory_space<vmem>>, vector<4x128xf32>,
    return
  }
  func.func @transform_0(%arg0: i32) -> (i32, i32) {
    %c0_i32 = arith.constant 0 : i32
    %c0_i32_0 = arith.constant 0 : i32
    return %arg0, %c0_i32 : i32, i32
  }
  func.func @transform_1(%arg0: i32) -> (i32, i32) {
    %c0_i32 = arith.constant 0 : i32
    %c0_i32_0 = arith.constant 0 : i32
    %c0_i32_1 = arith.constant 0 : i32
    return %c0_i32, %c0_i32_0 : i32, i32
  }
  func.func @transform_2(%arg0: i32) -> (i32, i32) {
    %c0_i32 = arith.constant 0 : i32
    %c0_i32_0 = arith.constant 0 : i32
    return %arg0, %c0_i32 : i32, i32
  }
}

</mosaic_0001>

<bundles_post_ra>
// kernel: tpu_custom_call.1
= control target key start
LH: loop header
LB: loop body
LE: loop exit
PB: predicated region body
PF: predicated region fallthrough
CT: control target
= control target key end

     0   :  { %7 = vsyncpa [#allocation3], 0  ;;  %s144_s0 = inlined_call_operand.hbm [shape: f32[4,128], index: 0, kind: input, shape index: {}]   ;;  %s145_s1 = inlined_call_operand.vmem [shape: f32[1,128], index: 1, kind: input, shape index: {}]   ;;  %s146_s2 = inlined_call_operand.hbm [shape: f32[4,128], index: 2, kind: output, shape index: {}]  }
   0x1   :  { %8 = vsyncpa [#allocation4], 0  ;;  %s100_s9 = smov [#allocation2]   ;;  %s52_s13 = scalar_lea.hbm %s144_s0, 64 }
   0x2   :  { %s15_s10 = sshll.u32 %s100_s9, 4  ;;  %p53_p0 = scmp.ne.s32.totalorder %s144_s0, %s52_s13  ;;  %s16_s10 = int_to_ptr.vmem [resolvable:$true] %s15_s10 }
   0x3   :  { %p56_p1 = scmp.lt.u32.totalorder %s52_s13, %s144_s0 }
   0x5   :  { %p58_p2 = pnand %p56_p1, %p53_p0 }
   0x7   :  { %61 = shalt.err (!%p58_p2)
}
   0x8   :  { %s62_s18 = scalar_lea.vmem %s16_s10, 64  ;;  %p67_p4 = scmp.lt.s32.totalorder %s16_s10, %s16_s10 }
   0x9   :  { %p63_p3 = scmp.ne.s32.totalorder %s16_s10, %s62_s18  ;;  %p68_p5 = scmp.lt.s32.totalorder %s62_s18, %s62_s18 }
   0xb   :  { %p69_p6 = por %p68_p5, %p67_p4 }
   0xd   :  { %p70_p7 = pnand %p69_p6, %p63_p3 }
   0xf   :  { %73 = shalt.err (!%p70_p7)
}
  0x10   :  { %18 = dma.hbm_to_vmem [thread:$0]  %s144_s0, 64, %s16_s10, [#allocation3]  }
  0x11   :  { %96 = dma.done.wait [#allocation3], 64  }
  0x12   :  { %97 = vsyncadd [#allocation3], 4294967232  ;;  %s101_s21 = smov [#allocation5]   ;;  %v24_v0 = vld [vmem:[#allocation2] sm:$0xf] }
  0x13   :  { %s40_s22 = sshll.u32 %s101_s21, 4  ;;  %v49_v1 = vld [vmem:[%s145_s1] ss:$0 sm:$0xff]  ;;  %s41_s22 = int_to_ptr.vmem [resolvable:$true] %s40_s22 }
  0x14   :  { %v32_v2 = vadd.f32 %v49_v1, %v24_v0  ;;  %s74_s25 = scalar_lea.vmem %s41_s22, 64  ;;  %p79_p9 = scmp.lt.s32.totalorder %s41_s22, %s41_s22 }
  0x15   :  { %p75_p8 = scmp.ne.s32.totalorder %s41_s22, %s74_s25  ;;  %p80_p10 = scmp.lt.s32.totalorder %s74_s25, %s74_s25 }
  0x16   :  { %33 = vst [vmem:[#allocation5] sm:$0xf] %v32_v2 }
  0x17   :  { %p81_p11 = por %p80_p10, %p79_p9 }
  0x19   :  { %p82_p12 = pnand %p81_p11, %p75_p8 }
  0x1b   :  { %85 = shalt.err (!%p82_p12)
}
  0x1c   :  { %s86_s27 = scalar_lea.hbm %s146_s2, 64 }
  0x1d   :  { %p87_p13 = scmp.ne.s32.totalorder %s146_s2, %s86_s27  ;;  %p90_p0 = scmp.lt.u32.totalorder %s86_s27, %s146_s2 }
  0x1f   :  { %p92_p1 = pnand %p90_p0, %p87_p13 }
  0x21   :  { %95 = shalt.err (!%p92_p1)
}
  0x22   :  { %43 = dma.vmem_to_hbm [thread:$0]  %s41_s22, 64, %s146_s2, [#allocation4]  }
  0x23   :  { %98 = dma.done.wait [#allocation4], 64  }
  0x24   :  { %99 = vsyncadd [#allocation4], 4294967232 }
  0x25   :  { %47 = vsyncpa [#allocation3], 1 }
  0x26   :  { %48 = vsyncpa [#allocation4], 1 }

</bundles_post_ra>
